<compile_context>
chip_gen: v7x
topology: tpu7x:2x2x1
jax: 0.10.0
libtpu: 0.0.40
codegen_flags: <defaults>
</compile_context>

<pallas_src>
import functools

import jax
import jax.numpy as jnp
import numpy as np
from jax.experimental import pallas as pl
from jax.experimental.pallas import tpu as pltpu

TEMP = 4.0  # temperature used in ChannelWiseDivergence


# --------------------------------------------------------------------------- #
# Small helpers
# --------------------------------------------------------------------------- #
def _cdiv(a, b):
    return -(-a // b)


def _round_up(a, b):
    return _cdiv(a, b) * b


@functools.lru_cache(maxsize=None)
def _vmem_plan():
    """(tile working-set budget, vmem_limit_bytes), generation-aware."""
    try:
        cap = int(pltpu.get_tpu_info().vmem_capacity_bytes)
    except Exception:
        cap = 0  # unknown -> use the conservative plan
    if cap > (64 << 20):            # v5e / v6e: 128 MiB physical VMEM
        return (24 << 20, 48 << 20)
    # v7x (64 MiB per TensorCore) or unknown: stay conservative.
    return (16 << 20, 28 << 20)


# --------------------------------------------------------------------------- #
# Shared per-row math
# --------------------------------------------------------------------------- #
def _cwd_per_row(t_raw, s_raw):
    """Per-row KL-style contribution, shape (rows, 1).

    per_row = sum_l softmax(t)_l * (logsoftmax(t)_l - logsoftmax(s)_l)
            = sum_l(et * (zt - zs)) / sum_t + (log sum_s - log sum_t)
    Never materializes softmax over the full (rows, L) block.
    """
    t = t_raw.astype(jnp.float32) * (1.0 / TEMP)
    s = s_raw.astype(jnp.float32) * (1.0 / TEMP)

    zt = t - jnp.max(t, axis=-1, keepdims=True)
    zs = s - jnp.max(s, axis=-1, keepdims=True)
    et = jnp.exp(zt)
    sum_t = jnp.sum(et, axis=-1, keepdims=True)                  # (rows, 1)
    sum_s = jnp.sum(jnp.exp(zs), axis=-1, keepdims=True)         # (rows, 1)

    num = jnp.sum(et * (zt - zs), axis=-1, keepdims=True)        # (rows, 1)
    inv_sum_t = pl.reciprocal(sum_t, approx=False)               # exact, per-row
    return num * inv_sum_t + (jnp.log(sum_s) - jnp.log(sum_t))   # (rows, 1)


# --------------------------------------------------------------------------- #
# Path 1: fused single-launch kernel (all scales fit comfortably in VMEM)
# --------------------------------------------------------------------------- #
def _make_fused_kernel(coeffs):
    n = len(coeffs)

    def kernel(*refs):
        t_refs = refs[:n]
        s_refs = refs[n:2 * n]
        o_ref = refs[2 * n]
        total = jnp.float32(0.0)
        for i in range(n):
            per_row = _cwd_per_row(t_refs[i][...], s_refs[i][...])
            total = total + jnp.float32(coeffs[i]) * jnp.sum(per_row)
        # One unmasked full-vreg store; wrapper reads [0, 0].
        o_ref[...] = jnp.full(o_ref.shape, total, dtype=o_ref.dtype)

    return kernel


def _cwd_fused_call(t2d_list, s2d_list, coeffs):
    _, vmem_limit = _vmem_plan()
    inputs = list(t2d_list) + list(s2d_list)
    in_specs = [pl.BlockSpec(x.shape, lambda i: (0, 0)) for x in inputs]
    out = pl.pallas_call(
        _make_fused_kernel(tuple(coeffs)),
        out_shape=jax.ShapeDtypeStruct((8, 128), jnp.float32),
        grid=(1,),
        in_specs=in_specs,
        out_specs=pl.BlockSpec((8, 128), lambda i: (0, 0)),
        compiler_params=pltpu.CompilerParams(
            dimension_semantics=("arbitrary",),
            vmem_limit_bytes=vmem_limit),
    )(*inputs)
    return out[0, 0]


# --------------------------------------------------------------------------- #
# Path 2: tiled per-scale kernel (large maps) — parallel partials, no padding
# --------------------------------------------------------------------------- #
def _make_tile_kernel(R, TR):
    def kernel(t_ref, s_ref, o_ref):
        i = pl.program_id(0)
        rows_left = R - i * TR                                   # valid rows in tile
        row_ids = jax.lax.broadcasted_iota(jnp.int32, (TR, 1), 0)
        valid = row_ids < rows_left

        per_row = _cwd_per_row(t_ref[...], s_ref[...])           # (TR, 1)
        # Select (not multiply) so NaN/Inf in garbage tail rows cannot leak.
        per_row = jnp.where(valid, per_row, jnp.float32(0.0))
        contrib = jnp.sum(per_row)
        # Lane/sublane-dense (1, 8, 128) partial per tile; summed in wrapper.
        o_ref[...] = jnp.full(o_ref.shape, contrib, dtype=o_ref.dtype)

    return kernel


def _cwd_tiled_call(t2d, s2d, *, tile_budget_bytes=None):
    """Unscaled sum_r sum_l softmax_t * (logsoftmax_t - logsoftmax_s)."""
    R, L = t2d.shape
    itemsize = t2d.dtype.itemsize
    budget, vmem_limit = _vmem_plan()
    if tile_budget_bytes is not None:
        budget = tile_budget_bytes

    # Working set per grid step:
    #   inputs : 2 arrays x 2 pipeline buffers x TR*L*itemsize
    #   temps  : ~4 live full-block f32 temporaries (zt, zs, et, et*(zt-zs))
    per_row_bytes = L * (4 * itemsize + 4 * 4)
    TR = max(8, (budget // per_row_bytes) // 8 * 8)
    r_up8 = _round_up(R, 8)
    TR = int(min(TR, r_up8))
    # Keep >= 2 grid steps whenever possible so v7x's two TensorCores both get
    # work under "parallel" (no-op for single-TC v5e/v6e).
    if r_up8 > 8:
        TR = int(min(TR, max(8, _round_up(_cdiv(R, 2), 8))))
    G = _cdiv(R, TR)

    out = pl.pallas_call(
        _make_tile_kernel(R, TR),
        out_shape=jax.ShapeDtypeStruct((G, 8, 128), jnp.float32),
        grid=(G,),
        in_specs=[
            pl.BlockSpec((TR, L), lambda i: (i, 0)),
            pl.BlockSpec((TR, L), lambda i: (i, 0)),
        ],
        out_specs=pl.BlockSpec((1, 8, 128), lambda i: (i, 0, 0)),
        compiler_params=pltpu.CompilerParams(
            dimension_semantics=("parallel",),
            vmem_limit_bytes=vmem_limit),
    )(t2d, s2d)
    return jnp.sum(out[:, 0, 0])


# --------------------------------------------------------------------------- #
# Public API
# --------------------------------------------------------------------------- #
def channelwise_divergence(feat_t, feat_s):
    """Pallas implementation of ChannelWiseDivergence for one NCHW pair."""
    assert feat_t.shape == feat_s.shape
    N, C, H, W = feat_t.shape
    raw = _cwd_tiled_call(feat_t.reshape(N * C, H * W),
                          feat_s.reshape(N * C, H * W))
    return raw * (TEMP ** 2) / (C * N)


def alignment_loss(teacher_feats, student_feats, loss_weight,
                   fuse_bytes_budget=4 << 20):
    """Weighted sum of ChannelWiseDivergence over the multi-scale features."""
    n = len(loss_weight)
    t2d, s2d, coeffs = [], [], []
    total_bytes = 0
    for i in range(n):
        ft, fs = teacher_feats[i], student_feats[i]
        assert ft.shape == fs.shape
        N, C, H, W = ft.shape
        t2d.append(ft.reshape(N * C, H * W))
        s2d.append(fs.reshape(N * C, H * W))
        coeffs.append(float(loss_weight[i]) * (TEMP ** 2) / (C * N))
        total_bytes += 2 * ft.size * ft.dtype.itemsize

    if total_bytes <= fuse_bytes_budget:
        # One kernel launch for all scales (removes ~75% of fixed launch cost).
        return _cwd_fused_call(t2d, s2d, coeffs)

    # Large feature maps: per-scale tiled launches with parallel partial sums.
    total = jnp.float32(0.0)
    for ti, si, c in zip(t2d, s2d, coeffs):
        total = total + jnp.float32(c) * _cwd_tiled_call(ti, si)
    return total


class AlignmentLoss:
    """JAX/Pallas port of AlignmentLoss (forward pass only)."""

    def __init__(self, loss_weight, loss_name="loss_guidance",
                 inter_transform_type="linear"):
        self.loss_weight = loss_weight          # sequence of 4 scalars
        self._loss_name = loss_name
        self.inter_transform_type = inter_transform_type

    def __call__(self, x_guidance_feature):
        teacher_feats, student_feats = x_guidance_feature[0], x_guidance_feature[1]
        return alignment_loss([teacher_feats[i] for i in range(4)],
                              [student_feats[i] for i in range(4)],
                              [self.loss_weight[i] for i in range(4)])

    @property
    def loss_name(self):
        return self._loss_name


# ---------------- pure-JAX reference (for correctness check) ----------------
def _cwd_ref(feat_t, feat_s):
    N, C, H, W = feat_t.shape
    t = feat_t.reshape(-1, H * W) / TEMP
    s = feat_s.reshape(-1, H * W) / TEMP
    soft_t = jax.nn.softmax(t, axis=1)
    loss = jnp.sum(soft_t * jax.nn.log_softmax(t, axis=1)
                   - soft_t * jax.nn.log_softmax(s, axis=1)) * (TEMP ** 2)
    return loss / (C * N)


if __name__ == "__main__":
    key = jax.random.PRNGKey(0)

    # 4 multi-scale feature pairs (teacher, student), NCHW.
    shapes = [(2, 4, 16, 16), (2, 8, 8, 8), (2, 8, 8, 8), (2, 16, 4, 4)]
    loss_weight = [1.0, 0.7, 0.5, 0.3]

    teacher_feats, student_feats = [], []
    for shp in shapes:
        key, k1, k2 = jax.random.split(key, 3)
        teacher_feats.append(jax.random.normal(k1, shp, dtype=jnp.float32))
        student_feats.append(jax.random.normal(k2, shp, dtype=jnp.float32))

    # --- fused single-launch path (the path used for these shapes) ----------
    loss_fn = AlignmentLoss(loss_weight=loss_weight)
    loss = jax.block_until_ready(loss_fn((teacher_feats, student_feats)))

    ref = jnp.float32(0.0)
    for i in range(4):
        ref = ref + loss_weight[i] * _cwd_ref(teacher_feats[i], student_feats[i])
    ref = jax.block_until_ready(ref)
    assert np.allclose(np.asarray(loss), np.asarray(ref), rtol=2e-3, atol=1e-5), \
        (float(loss), float(ref))

    # --- tiled fallback: multi-step parallel grid, rows divide exactly ------
    N1, C1, H1, W1 = shapes[1]
    t1 = teacher_feats[1].reshape(N1 * C1, H1 * W1)
    s1 = student_feats[1].reshape(N1 * C1, H1 * W1)
    raw = _cwd_tiled_call(t1, s1, tile_budget_bytes=8 * 64 * 4)   # forces TR=8, G=2
    tiled = jax.block_until_ready(raw * (TEMP ** 2) / (C1 * N1))
    ref1 = _cwd_ref(teacher_feats[1], student_feats[1])
    assert np.allclose(np.asarray(tiled), np.asarray(ref1), rtol=2e-3, atol=1e-5)

    # --- tail-masked tile: R not a multiple of 8, single partial block ------
    key, k1, k2 = jax.random.split(key, 3)
    tp = jax.random.normal(k1, (1, 3, 8, 8), dtype=jnp.float32)
    sp = jax.random.normal(k2, (1, 3, 8, 8), dtype=jnp.float32)
    pad_loss = jax.block_until_ready(channelwise_divergence(tp, sp))
    ref_p = _cwd_ref(tp, sp)
    assert np.allclose(np.asarray(pad_loss), np.asarray(ref_p), rtol=2e-3, atol=1e-5)

    # --- multi-tile grid with a partial tail tile (R=20 -> TR=8, G=3) -------
    key, k1, k2 = jax.random.split(key, 3)
    tm_ = jax.random.normal(k1, (2, 10, 8, 8), dtype=jnp.float32)
    sm_ = jax.random.normal(k2, (2, 10, 8, 8), dtype=jnp.float32)
    Rm, Lm = 2 * 10, 8 * 8
    raw_m = _cwd_tiled_call(tm_.reshape(Rm, Lm), sm_.reshape(Rm, Lm),
                            tile_budget_bytes=8 * 64 * 4)         # TR=8 -> G=3
    tail_loss = jax.block_until_ready(raw_m * (TEMP ** 2) / (10 * 2))
    ref_m = _cwd_ref(tm_, sm_)
    assert np.allclose(np.asarray(tail_loss), np.asarray(ref_m), rtol=2e-3, atol=1e-5)

    print("KERNEL_OK")
</pallas_src>

<mosaic_0001>
module attributes {stable_mosaic.version = 11 : i64} {
  func.func @kernel(%arg0: i32, %arg1: memref<8x256xf32, #tpu.memory_space<vmem>>, %arg2: memref<16x64xf32, #tpu.memory_space<vmem>>, %arg3: memref<16x64xf32, #tpu.memory_space<vmem>>, %arg4: memref<32x16xf32, #tpu.memory_space<vmem>>, %arg5: memref<8x256xf32, #tpu.memory_space<vmem>>, %arg6: memref<16x64xf32, #tpu.memory_space<vmem>>, %arg7: memref<16x64xf32, #tpu.memory_space<vmem>>, %arg8: memref<32x16xf32, #tpu.memory_space<vmem>>, %arg9: memref<8x128xf32, #tpu.memory_space<vmem>>) attributes {dimension_semantics = [#tpu.dimension_semantics<arbitrary>], iteration_bounds = array<i64: 1>, scalar_prefetch = 0 : i64, scratch_operands = 0 : i64, tpu.core_type = #tpu.core_type<tc>, window_params = [{pipeline_mode = #tpu.pipeline_mode<synchronous>, transform_indices = @transform_0, window_bounds = array<i64: 8, 256>}, {pipeline_mode = #tpu.pipeline_mode<synchronous>, transform_indices = @transform_1, window_bounds = array<i64: 16, 64>}, {pipeline_mode = #tpu.pipeline_mode<synchronous>, transform_indices = @transform_2, window_bounds = array<i64: 16, 64>}, {pipeline_mode = #tpu.pipeline_mode<synchronous>, transform_indices = @transform_3, window_bounds = array<i64: 32, 16>}, {pipeline_mode = #tpu.pipeline_mode<synchronous>, transform_indices = @transform_4, window_bounds = array<i64: 8, 256>}, {pipeline_mode = #tpu.pipeline_mode<synchronous>, transform_indices = @transform_5, window_bounds = array<i64: 16, 64>}, {pipeline_mode = #tpu.pipeline_mode<synchronous>, transform_indices = @transform_6, window_bounds = array<i64: 16, 64>}, {pipeline_mode = #tpu.pipeline_mode<synchronous>, transform_indices = @transform_7, window_bounds = array<i64: 32, 16>}, {pipeline_mode = #tpu.pipeline_mode<synchronous>, transform_indices = @transform_8, window_bounds = array<i64: 8, 128>}]} {
    %c0 = arith.constant 0 : index
    %c0_0 = arith.constant 0 : index
    %0 = vector.load %arg1[%c0, %c0_0] : memref<8x256xf32, #tpu.memory_space<vmem>>, vector<8x256xf32>
    %c0_1 = arith.constant 0 : index
    %c0_2 = arith.constant 0 : index
    %1 = vector.load %arg5[%c0_1, %c0_2] : memref<8x256xf32, #tpu.memory_space<vmem>>, vector<8x256xf32>
    %cst = arith.constant 2.500000e-01 : f32
    %2 = vector.broadcast %cst : f32 to vector<8x256xf32>
    %3 = arith.mulf %0, %2 : vector<8x256xf32>
    %cst_3 = arith.constant 2.500000e-01 : f32
    %4 = vector.broadcast %cst_3 : f32 to vector<8x256xf32>
    %5 = arith.mulf %1, %4 : vector<8x256xf32>
    %cst_4 = arith.constant dense<0xFF800000> : vector<8xf32>
    %6 = vector.multi_reduction <maximumf>, %3, %cst_4 [1] : vector<8x256xf32> to vector<8xf32>
    %7 = vector.shape_cast %6 : vector<8xf32> to vector<8x1xf32>
    %8 = vector.broadcast %7 : vector<8x1xf32> to vector<8x256xf32>
    %9 = arith.subf %3, %8 : vector<8x256xf32>
    %cst_5 = arith.constant dense<0xFF800000> : vector<8xf32>
    %10 = vector.multi_reduction <maximumf>, %5, %cst_5 [1] : vector<8x256xf32> to vector<8xf32>
    %11 = vector.shape_cast %10 : vector<8xf32> to vector<8x1xf32>
    %12 = vector.broadcast %11 : vector<8x1xf32> to vector<8x256xf32>
    %13 = arith.subf %5, %12 : vector<8x256xf32>
    %14 = math.exp %9 : vector<8x256xf32>
    %cst_6 = arith.constant dense<0.000000e+00> : vector<8xf32>
    %15 = vector.multi_reduction <add>, %14, %cst_6 [1] : vector<8x256xf32> to vector<8xf32>
    %16 = vector.shape_cast %15 : vector<8xf32> to vector<8x1xf32>
    %17 = math.exp %13 : vector<8x256xf32>
    %cst_7 = arith.constant dense<0.000000e+00> : vector<8xf32>
    %18 = vector.multi_reduction <add>, %17, %cst_7 [1] : vector<8x256xf32> to vector<8xf32>
    %19 = vector.shape_cast %18 : vector<8xf32> to vector<8x1xf32>
    %20 = arith.subf %9, %13 : vector<8x256xf32>
    %21 = arith.mulf %14, %20 : vector<8x256xf32>
    %cst_8 = arith.constant dense<0.000000e+00> : vector<8xf32>
    %22 = vector.multi_reduction <add>, %21, %cst_8 [1] : vector<8x256xf32> to vector<8xf32>
    %23 = vector.shape_cast %22 : vector<8xf32> to vector<8x1xf32>
    %24 = tpu.reciprocal %16 : vector<8x1xf32> -> vector<8x1xf32>
    %25 = arith.mulf %23, %24 : vector<8x1xf32>
    %26 = math.log %19 : vector<8x1xf32>
    %27 = math.log %16 : vector<8x1xf32>
    %28 = arith.subf %26, %27 : vector<8x1xf32>
    %29 = arith.addf %25, %28 : vector<8x1xf32>
    %30 = vector.shape_cast %29 : vector<8x1xf32> to vector<1x8x1xf32>
    %cst_9 = arith.constant dense<0.000000e+00> : vector<1xf32>
    %31 = vector.multi_reduction <add>, %30, %cst_9 [1, 2] : vector<1x8x1xf32> to vector<1xf32>
    %32 = vector.shape_cast %31 : vector<1xf32> to vector<1x1x1xf32>
    %33 = vector.extract %32[0, 0, 0] : f32 from vector<1x1x1xf32>
    %cst_10 = arith.constant 2.000000e+00 : f32
    %34 = arith.mulf %cst_10, %33 : f32
    %cst_11 = arith.constant 0.000000e+00 : f32
    %35 = arith.addf %cst_11, %34 : f32
    %c0_12 = arith.constant 0 : index
    %c0_13 = arith.constant 0 : index
    %36 = vector.load %arg2[%c0_12, %c0_13] : memref<16x64xf32, #tpu.memory_space<vmem>>, vector<16x64xf32>
    %c0_14 = arith.constant 0 : index
    %c0_15 = arith.constant 0 : index
    %37 = vector.load %arg6[%c0_14, %c0_15] : memref<16x64xf32, #tpu.memory_space<vmem>>, vector<16x64xf32>
    %cst_16 = arith.constant 2.500000e-01 : f32
    %38 = vector.broadcast %cst_16 : f32 to vector<16x64xf32>
    %39 = arith.mulf %36, %38 : vector<16x64xf32>
    %cst_17 = arith.constant 2.500000e-01 : f32
    %40 = vector.broadcast %cst_17 : f32 to vector<16x64xf32>
    %41 = arith.mulf %37, %40 : vector<16x64xf32>
    %cst_18 = arith.constant dense<0xFF800000> : vector<16xf32>
    %42 = vector.multi_reduction <maximumf>, %39, %cst_18 [1] : vector<16x64xf32> to vector<16xf32>
    %43 = vector.shape_cast %42 : vector<16xf32> to vector<16x1xf32>
    %44 = vector.broadcast %43 : vector<16x1xf32> to vector<16x64xf32>
    %45 = arith.subf %39, %44 : vector<16x64xf32>
    %cst_19 = arith.constant dense<0xFF800000> : vector<16xf32>
    %46 = vector.multi_reduction <maximumf>, %41, %cst_19 [1] : vector<16x64xf32> to vector<16xf32>
    %47 = vector.shape_cast %46 : vector<16xf32> to vector<16x1xf32>
    %48 = vector.broadcast %47 : vector<16x1xf32> to vector<16x64xf32>
    %49 = arith.subf %41, %48 : vector<16x64xf32>
    %50 = math.exp %45 : vector<16x64xf32>
    %cst_20 = arith.constant dense<0.000000e+00> : vector<16xf32>
    %51 = vector.multi_reduction <add>, %50, %cst_20 [1] : vector<16x64xf32> to vector<16xf32>
    %52 = vector.shape_cast %51 : vector<16xf32> to vector<16x1xf32>
    %53 = math.exp %49 : vector<16x64xf32>
    %cst_21 = arith.constant dense<0.000000e+00> : vector<16xf32>
    %54 = vector.multi_reduction <add>, %53, %cst_21 [1] : vector<16x64xf32> to vector<16xf32>
    %55 = vector.shape_cast %54 : vector<16xf32> to vector<16x1xf32>
    %56 = arith.subf %45, %49 : vector<16x64xf32>
    %57 = arith.mulf %50, %56 : vector<16x64xf32>
    %cst_22 = arith.constant dense<0.000000e+00> : vector<16xf32>
    %58 = vector.multi_reduction <add>, %57, %cst_22 [1] : vector<16x64xf32> to vector<16xf32>
    %59 = vector.shape_cast %58 : vector<16xf32> to vector<16x1xf32>
    %60 = tpu.reciprocal %52 : vector<16x1xf32> -> vector<16x1xf32>
    %61 = arith.mulf %59, %60 : vector<16x1xf32>
    %62 = math.log %55 : vector<16x1xf32>
    %63 = math.log %52 : vector<16x1xf32>
    %64 = arith.subf %62, %63 : vector<16x1xf32>
    %65 = arith.addf %61, %64 : vector<16x1xf32>
    %66 = vector.shape_cast %65 : vector<16x1xf32> to vector<1x16x1xf32>
    %cst_23 = arith.constant dense<0.000000e+00> : vector<1xf32>
    %67 = vector.multi_reduction <add>, %66, %cst_23 [1, 2] : vector<1x16x1xf32> to vector<1xf32>
    %68 = vector.shape_cast %67 : vector<1xf32> to vector<1x1x1xf32>
    %69 = vector.extract %68[0, 0, 0] : f32 from vector<1x1x1xf32>
    %cst_24 = arith.constant 0.699999988 : f32
    %70 = arith.mulf %cst_24, %69 : f32
    %71 = arith.addf %35, %70 : f32
    %c0_25 = arith.constant 0 : index
    %c0_26 = arith.constant 0 : index
    %72 = vector.load %arg3[%c0_25, %c0_26] : memref<16x64xf32, #tpu.memory_space<vmem>>, vector<16x64xf32>
    %c0_27 = arith.constant 0 : index
    %c0_28 = arith.constant 0 : index
    %73 = vector.load %arg7[%c0_27, %c0_28] : memref<16x64xf32, #tpu.memory_space<vmem>>, vector<16x64xf32>
    %cst_29 = arith.constant 2.500000e-01 : f32
    %74 = vector.broadcast %cst_29 : f32 to vector<16x64xf32>
    %75 = arith.mulf %72, %74 : vector<16x64xf32>
    %cst_30 = arith.constant 2.500000e-01 : f32
    %76 = vector.broadcast %cst_30 : f32 to vector<16x64xf32>
    %77 = arith.mulf %73, %76 : vector<16x64xf32>
    %cst_31 = arith.constant dense<0xFF800000> : vector<16xf32>
    %78 = vector.multi_reduction <maximumf>, %75, %cst_31 [1] : vector<16x64xf32> to vector<16xf32>
    %79 = vector.shape_cast %78 : vector<16xf32> to vector<16x1xf32>
    %80 = vector.broadcast %79 : vector<16x1xf32> to vector<16x64xf32>
    %81 = arith.subf %75, %80 : vector<16x64xf32>
    %cst_32 = arith.constant dense<0xFF800000> : vector<16xf32>
    %82 = vector.multi_reduction <maximumf>, %77, %cst_32 [1] : vector<16x64xf32> to vector<16xf32>
    %83 = vector.shape_cast %82 : vector<16xf32> to vector<16x1xf32>
    %84 = vector.broadcast %83 : vector<16x1xf32> to vector<16x64xf32>
    %85 = arith.subf %77, %84 : vector<16x64xf32>
    %86 = math.exp %81 : vector<16x64xf32>
    %cst_33 = arith.constant dense<0.000000e+00> : vector<16xf32>
    %87 = vector.multi_reduction <add>, %86, %cst_33 [1] : vector<16x64xf32> to vector<16xf32>
    %88 = vector.shape_cast %87 : vector<16xf32> to vector<16x1xf32>
    %89 = math.exp %85 : vector<16x64xf32>
    %cst_34 = arith.constant dense<0.000000e+00> : vector<16xf32>
    %90 = vector.multi_reduction <add>, %89, %cst_34 [1] : vector<16x64xf32> to vector<16xf32>
    %91 = vector.shape_cast %90 : vector<16xf32> to vector<16x1xf32>
    %92 = arith.subf %81, %85 : vector<16x64xf32>
    %93 = arith.mulf %86, %92 : vector<16x64xf32>
    %cst_35 = arith.constant dense<0.000000e+00> : vector<16xf32>
    %94 = vector.multi_reduction <add>, %93, %cst_35 [1] : vector<16x64xf32> to vector<16xf32>
    %95 = vector.shape_cast %94 : vector<16xf32> to vector<16x1xf32>
    %96 = tpu.reciprocal %88 : vector<16x1xf32> -> vector<16x1xf32>
    %97 = arith.mulf %95, %96 : vector<16x1xf32>
    %98 = math.log %91 : vector<16x1xf32>
    %99 = math.log %88 : vector<16x1xf32>
    %100 = arith.subf %98, %99 : vector<16x1xf32>
    %101 = arith.addf %97, %100 : vector<16x1xf32>
    %102 = vector.shape_cast %101 : vector<16x1xf32> to vector<1x16x1xf32>
    %cst_36 = arith.constant dense<0.000000e+00> : vector<1xf32>
    %103 = vector.multi_reduction <add>, %102, %cst_36 [1, 2] : vector<1x16x1xf32> to vector<1xf32>
    %104 = vector.shape_cast %103 : vector<1xf32> to vector<1x1x1xf32>
    %105 = vector.extract %104[0, 0, 0] : f32 from vector<1x1x1xf32>
    %cst_37 = arith.constant 5.000000e-01 : f32
    %106 = arith.mulf %cst_37, %105 : f32
    %107 = arith.addf %71, %106 : f32
    %c0_38 = arith.constant 0 : index
    %c0_39 = arith.constant 0 : index
    %108 = vector.load %arg4[%c0_38, %c0_39] : memref<32x16xf32, #tpu.memory_space<vmem>>, vector<32x16xf32>
    %c0_40 = arith.constant 0 : index
    %c0_41 = arith.constant 0 : index
    %109 = vector.load %arg8[%c0_40, %c0_41] : memref<32x16xf32, #tpu.memory_space<vmem>>, vector<32x16xf32>
    %cst_42 = arith.constant 2.500000e-01 : f32
    %110 = vector.broadcast %cst_42 : f32 to vector<32x16xf32>
    %111 = arith.mulf %108, %110 : vector<32x16xf32>
    %cst_43 = arith.constant 2.500000e-01 : f32
    %112 = vector.broadcast %cst_43 : f32 to vector<32x16xf32>
    %113 = arith.mulf %109, %112 : vector<32x16xf32>
    %cst_44 = arith.constant dense<0xFF800000> : vector<32xf32>
    %114 = vector.multi_reduction <maximumf>, %111, %cst_44 [1] : vector<32x16xf32> to vector<32xf32>
    %115 = vector.shape_cast %114 : vector<32xf32> to vector<32x1xf32>
    %116 = vector.broadcast %115 : vector<32x1xf32> to vector<32x16xf32>
    %117 = arith.subf %111, %116 : vector<32x16xf32>
    %cst_45 = arith.constant dense<0xFF800000> : vector<32xf32>
    %118 = vector.multi_reduction <maximumf>, %113, %cst_45 [1] : vector<32x16xf32> to vector<32xf32>
    %119 = vector.shape_cast %118 : vector<32xf32> to vector<32x1xf32>
    %120 = vector.broadcast %119 : vector<32x1xf32> to vector<32x16xf32>
    %121 = arith.subf %113, %120 : vector<32x16xf32>
    %122 = math.exp %117 : vector<32x16xf32>
    %cst_46 = arith.constant dense<0.000000e+00> : vector<32xf32>
    %123 = vector.multi_reduction <add>, %122, %cst_46 [1] : vector<32x16xf32> to vector<32xf32>
    %124 = vector.shape_cast %123 : vector<32xf32> to vector<32x1xf32>
    %125 = math.exp %121 : vector<32x16xf32>
    %cst_47 = arith.constant dense<0.000000e+00> : vector<32xf32>
    %126 = vector.multi_reduction <add>, %125, %cst_47 [1] : vector<32x16xf32> to vector<32xf32>
    %127 = vector.shape_cast %126 : vector<32xf32> to vector<32x1xf32>
    %128 = arith.subf %117, %121 : vector<32x16xf32>
    %129 = arith.mulf %122, %128 : vector<32x16xf32>
    %cst_48 = arith.constant dense<0.000000e+00> : vector<32xf32>
    %130 = vector.multi_reduction <add>, %129, %cst_48 [1] : vector<32x16xf32> to vector<32xf32>
    %131 = vector.shape_cast %130 : vector<32xf32> to vector<32x1xf32>
    %132 = tpu.reciprocal %124 : vector<32x1xf32> -> vector<32x1xf32>
    %133 = arith.mulf %131, %132 : vector<32x1xf32>
    %134 = math.log %127 : vector<32x1xf32>
    %135 = math.log %124 : vector<32x1xf32>
    %136 = arith.subf %134, %135 : vector<32x1xf32>
    %137 = arith.addf %133, %136 : vector<32x1xf32>
    %138 = vector.shape_cast %137 : vector<32x1xf32> to vector<1x32x1xf32>
    %cst_49 = arith.constant dense<0.000000e+00> : vector<1xf32>
    %139 = vector.multi_reduction <add>, %138, %cst_49 [1, 2] : vector<1x32x1xf32> to vector<1xf32>
    %140 = vector.shape_cast %139 : vector<1xf32> to vector<1x1x1xf32>
    %141 = vector.extract %140[0, 0, 0] : f32 from vector<1x1x1xf32>
    %cst_50 = arith.constant 1.500000e-01 : f32
    %142 = arith.mulf %cst_50, %141 : f32
    %143 = arith.addf %107, %142 : f32
    %144 = vector.broadcast %143 : f32 to vector<8x128xf32>
    %c0_51 = arith.constant 0 : index
    %c0_52 = arith.constant 0 : index
    %145 = vector.load %arg9[%c0_51, %c0_52] : memref<8x128xf32, #tpu.memory_space<vmem>>, vector<8x128xf32>
    tpu.vector_store %arg9[%c0_51, %c0_52], %144 {strides = array<i32>} : memref<8x128xf32, #tpu.memory_space<vmem>>, vector<8x128xf32>,
    return
  }
  func.func @transform_0(%arg0: i32) -> (i32, i32) {
    %c0_i32 = arith.constant 0 : i32
    %c0_i32_0 = arith.constant 0 : i32
    %c0_i32_1 = arith.constant 0 : i32
    return %c0_i32, %c0_i32_0 : i32, i32
  }
  func.func @transform_1(%arg0: i32) -> (i32, i32) {
    %c0_i32 = arith.constant 0 : i32
    %c0_i32_0 = arith.constant 0 : i32
    %c0_i32_1 = arith.constant 0 : i32
    return %c0_i32, %c0_i32_0 : i32, i32
  }
  func.func @transform_2(%arg0: i32) -> (i32, i32) {
    %c0_i32 = arith.constant 0 : i32
    %c0_i32_0 = arith.constant 0 : i32
    %c0_i32_1 = arith.constant 0 : i32
    return %c0_i32, %c0_i32_0 : i32, i32
  }
  func.func @transform_3(%arg0: i32) -> (i32, i32) {
    %c0_i32 = arith.constant 0 : i32
    %c0_i32_0 = arith.constant 0 : i32
    %c0_i32_1 = arith.constant 0 : i32
    return %c0_i32, %c0_i32_0 : i32, i32
  }
  func.func @transform_4(%arg0: i32) -> (i32, i32) {
    %c0_i32 = arith.constant 0 : i32
    %c0_i32_0 = arith.constant 0 : i32
    %c0_i32_1 = arith.constant 0 : i32
    return %c0_i32, %c0_i32_0 : i32, i32
  }
  func.func @transform_5(%arg0: i32) -> (i32, i32) {
    %c0_i32 = arith.constant 0 : i32
    %c0_i32_0 = arith.constant 0 : i32
    %c0_i32_1 = arith.constant 0 : i32
    return %c0_i32, %c0_i32_0 : i32, i32
  }
  func.func @transform_6(%arg0: i32) -> (i32, i32) {
    %c0_i32 = arith.constant 0 : i32
    %c0_i32_0 = arith.constant 0 : i32
    %c0_i32_1 = arith.constant 0 : i32
    return %c0_i32, %c0_i32_0 : i32, i32
  }
  func.func @transform_7(%arg0: i32) -> (i32, i32) {
    %c0_i32 = arith.constant 0 : i32
    %c0_i32_0 = arith.constant 0 : i32
    %c0_i32_1 = arith.constant 0 : i32
    return %c0_i32, %c0_i32_0 : i32, i32
  }
  func.func @transform_8(%arg0: i32) -> (i32, i32) {
    %c0_i32 = arith.constant 0 : i32
    %c0_i32_0 = arith.constant 0 : i32
    %c0_i32_1 = arith.constant 0 : i32
    return %c0_i32, %c0_i32_0 : i32, i32
  }
}

</mosaic_0001>

<bundles_post_ra>
// kernel: tpu_custom_call.1
= control target key start
LH: loop header
LB: loop body
LE: loop exit
PB: predicated region body
PF: predicated region fallthrough
CT: control target
= control target key end

     0   :  { %vm98_vm0 = vcmask 523264   ;;  %vm275_vm1 = vcmask 130048   ;;  %s904_s0 = inlined_call_operand.vmem [shape: f32[8,256], index: 0, kind: input, shape index: {}]   ;;  %s905_s1 = inlined_call_operand.vmem [shape: f32[16,64], index: 1, kind: input, shape index: {}]   ;;  %s906_s2 = inlined_call_operand.vmem [shape: f32[16,64], index: 2, kind: input, shape index: {}]   ;;  %s907_s3 = inlined_call_operand.vmem [shape: f32[32,16], index: 3, kind: input, shape index: {}]   ;;  %s908_s4 = inlined_call_operand.vmem [shape: f32[8,256], index: 4, kind: input, shape index: {}]   ;;  %s909_s5 = inlined_call_operand.vmem [shape: f32[16,64], index: 5, kind: input, shape index: {}]   ;;  %s910_s6 = inlined_call_operand.vmem [shape: f32[16,64], index: 6, kind: input, shape index: {}]   ;;  %s911_s7 = inlined_call_operand.vmem [shape: f32[32,16], index: 7, kind: input, shape index: {}]   ;;  %s912_s8 = inlined_call_operand.hbm [shape: f32[8,128], index: 8, kind: output, shape index: {}]  }
   0x1   :  { %v92_v0 = vld [vmem:[%s909_s5] sm:$0xff]  ;;  %v93_v2 = vld [vmem:[%s909_s5 + $0x8] sm:$0xff] }
   0x2   :  { %v90_v1 = vld [vmem:[%s905_s1] sm:$0xff]  ;;  %v616_v3 = vmul.f32 0.25, %v92_v0  ;;  %v620_v5 = vmul.f32 0.25, %v93_v2  ;;  %v91_v6 = vld [vmem:[%s905_s1 + $0x8] sm:$0xff] }
   0x3   :  { %v618_v4 = vmul.f32 0.25, %v90_v1  ;;  %v625_v7 = vmul.f32 0.25, %v91_v6  ;;  %v260_v8 = vld [vmem:[%s907_s3 + $0x8] sm:$0xff]  ;;  %v259_v9 = vld [vmem:[%s907_s3] sm:$0xff] }
   0x4   :  { %v107_v10 = vsel %vm98_vm0, %v616_v3, -inf  ;;  %v110_v12 = vsel %vm98_vm0, %v620_v5, -inf  ;;  %v641_v14 = vmul.f32 0.25, %v260_v8  ;;  %v643_v15 = vmul.f32 0.25, %v259_v9  ;;  %v264_v16 = vld [vmem:[%s911_s7 + $0x8] sm:$0xff]  ;;  %v263_v17 = vld [vmem:[%s911_s7] sm:$0xff] }
   0x5   :  { %v99_v11 = vsel %vm98_vm0, %v618_v4, -inf  ;;  %108 = vmax.xlane.f32.xlu1 %v107_v10  ;;  %v102_v13 = vsel %vm98_vm0, %v625_v7, -inf  ;;  %v651_v18 = vmul.f32 0.25, %v264_v16  ;;  %v32_v19 = vld [vmem:[%s908_s4] sm:$0xff] }
   0x6   :  { %100 = vmax.xlane.f32.xlu0 %v99_v11 }
   0x9   :  { %111 = vmax.xlane.f32.xlu1 %v110_v12 }
   0xa   :  { %103 = vmax.xlane.f32.xlu0 %v102_v13 }
   0xb   :  { %13 = vsyncpa [#allocation3], 0  ;;  %v279_v20 = vsel %vm275_vm1, %v641_v14, -inf  ;;  %v276_v21 = vsel %vm275_vm1, %v643_v15, -inf  ;;  %v660_v22 = vmul.f32 0.25, %v263_v17  ;;  %v33_v23 = vld [vmem:[%s908_s4 + $0x8] sm:$0xff] }
   0xc   :  { %v30_v24 = vld [vmem:[%s904_s0] sm:$0xff]  ;;  %v31_v25 = vld [vmem:[%s904_s0 + $0x8] sm:$0xff]  ;;  %v671_v26 = vmul.f32 0.25, %v32_v19  ;;  %v673_v27 = vmul.f32 0.25, %v33_v23  ;;  %v295_v30 = vsel %vm275_vm1, %v651_v18, -inf  ;;  %v265_v44 = vld [vmem:[%s911_s7 + $0x10] sm:$0xff] }
   0xd   :  { %280 = vmax.xlane.f32.xlu1 %v279_v20  ;;  %v675_v28 = vmul.f32 0.25, %v30_v24  ;;  %v677_v29 = vmul.f32 0.25, %v31_v25  ;;  %v292_v31 = vsel %vm275_vm1, %v660_v22, -inf  ;;  %v176_v32 = vld [vmem:[%s906_s2 + $0x8] sm:$0xff]  ;;  %v175_v33 = vld [vmem:[%s906_s2] sm:$0xff]  ;;  %v261_v45 = vld [vmem:[%s907_s3 + $0x10] sm:$0xff] }
   0xe   :  { %277 = vmax.xlane.f32.xlu0 %v276_v21  ;;  %v43_v34 = vmax.f32 %v671_v26, %v673_v27  ;;  %v693_v36 = vmul.f32 0.25, %v176_v32  ;;  %v695_v37 = vmul.f32 0.25, %v175_v33  ;;  %v178_v38 = vld [vmem:[%s910_s6 + $0x8] sm:$0xff]  ;;  %v177_v39 = vld [vmem:[%s910_s6] sm:$0xff]  ;;  %v721_v48 = vmul.f32 0.25, %v265_v44  ;;  %v266_v50 = vld [vmem:[%s911_s7 + $0x18] sm:$0xff] }
   0xf   :  { %v38_v35 = vmax.f32 %v675_v28, %v677_v29  ;;  %v707_v42 = vmul.f32 0.25, %v178_v38  ;;  %v709_v43 = vmul.f32 0.25, %v177_v39  ;;  %v723_v49 = vmul.f32 0.25, %v261_v45  ;;  %v262_v51 = vld [vmem:[%s907_s3 + $0x18] sm:$0xff]  ;;  %s561_s21 = smov [#allocation2]  }
  0x10   :  { %v186_v40 = vsel %vm98_vm0, %v693_v36, -inf  ;;  %v183_v41 = vsel %vm98_vm0, %v695_v37, -inf  ;;  %v298_v52 = vsel %vm275_vm1, %v721_v48, -inf  ;;  %v735_v54 = vmul.f32 0.25, %v266_v50  ;;  %s426_s22 = sshll.u32 %s561_s21, 4  ;;  %s427_s22 = int_to_ptr.vmem [resolvable:$true] %s426_s22 }
  0x11   :  { %296 = vmax.xlane.f32.xlu1 %v295_v30  ;;  %v194_v46 = vsel %vm98_vm0, %v707_v42, -inf  ;;  %v191_v47 = vsel %vm98_vm0, %v709_v43, -inf  ;;  %v282_v53 = vsel %vm275_vm1, %v723_v49, -inf  ;;  %v737_v55 = vmul.f32 0.25, %v262_v51  ;;  %s537_s26 = scalar_lea.vmem %s427_s22, 128  ;;  %p542_p1 = scmp.lt.s32.totalorder %s427_s22, %s427_s22 }
  0x12   :  { %293 = vmax.xlane.f32.xlu0 %v292_v31  ;;  %v301_v56 = vsel %vm275_vm1, %v735_v54, -inf  ;;  %vm77_vm2 = vcmask 7168   ;;  %p538_p0 = scmp.ne.s32.totalorder %s427_s22, %s537_s26  ;;  %p543_p2 = scmp.lt.s32.totalorder %s537_s26, %s537_s26 }
  0x13   :  { %v285_v57 = vsel %vm275_vm1, %v737_v55, -inf }
  0x14   :  { %p544_p3 = por %p543_p2, %p542_p1 }
  0x15   :  { %44 = vmax.xlane.f32.xlu1 %v43_v34 }
  0x16   :  { %39 = vmax.xlane.f32.xlu0 %v38_v35  ;;  %p545_p4 = pnand %p544_p3, %p538_p0 }
  0x19   :  { %187 = vmax.xlane.f32.xlu1 %v186_v40 }
  0x1a   :  { %184 = vmax.xlane.f32.xlu0 %v183_v41 }
  0x1d   :  { %195 = vmax.xlane.f32.xlu1 %v194_v46 }
  0x1e   :  { %192 = vmax.xlane.f32.xlu0 %v191_v47 }
  0x21   :  { %299 = vmax.xlane.f32.xlu1 %v298_v52 }
  0x22   :  { %283 = vmax.xlane.f32.xlu0 %v282_v53 }
  0x25   :  { %302 = vmax.xlane.f32.xlu1 %v301_v56 }
  0x26   :  { %286 = vmax.xlane.f32.xlu0 %v285_v57 }
  0x92   :  { %v109_v58 = vpop.xlane.xlu1 %108 }
  0x93   :  { %v101_v59 = vpop.xlane.xlu0 %100  ;;  %v747_v61 = vsub.f32 %v616_v3, %v109_v58 }
  0x94   :  { %v744_v60 = vsub.f32 %v618_v4, %v101_v59 }
  0x95   :  { %v125_v1 = vmul.f32 1.442695, %v747_v61 }
  0x96   :  { %v115_v62 = vmul.f32 1.442695, %v744_v60  ;;  %v112_v63 = vpop.xlane.xlu1 %111 }
  0x97   :  { %v104_v0 = vpop.xlane.xlu0 %103  ;;  %v752_v2 = vsub.f32 %v620_v5, %v112_v63 }
  0x98   :  { %v755_v6 = vsub.f32 %v625_v7, %v104_v0  ;;  %443 = vpow2.f32 %v115_v62 }
  0x99   :  { %v127_v8 = vmul.f32 1.442695, %v752_v2  ;;  %445 = vpow2.f32 %v125_v1 }
  0x9a   :  { %v117_v4 = vmul.f32 1.442695, %v755_v6  ;;  %v281_v9 = vpop.xlane.xlu1 %280 }
  0x9b   :  { %v278_v3 = vpop.xlane.xlu0 %277  ;;  %v760_v10 = vsub.f32 %v641_v14, %v281_v9 }
  0x9c   :  { %v763_v11 = vsub.f32 %v643_v15, %v278_v3  ;;  %447 = vpow2.f32 %v117_v4 }
  0x9d   :  { %449 = vpow2.f32 %v127_v8  ;;  %v310_v13 = vmul.f32 1.442695, %v760_v10 }
  0x9e   :  { %v308_v5 = vmul.f32 1.442695, %v763_v11  ;;  %v297_v7 = vpop.xlane.xlu1 %296 }
  0x9f   :  { %v294_v12 = vpop.xlane.xlu0 %293  ;;  %v771_v17 = vsub.f32 %v651_v18, %v297_v7 }
  0xa0   :  { %v768_v16 = vsub.f32 %v660_v22, %v294_v12  ;;  %451 = vpow2.f32 %v308_v5 }
  0xa1   :  { %v330_v15 = vmul.f32 1.442695, %v771_v17  ;;  %453 = vpow2.f32 %v310_v13 }
  0xa2   :  { %v328_v14 = vmul.f32 1.442695, %v768_v16  ;;  %v774_v19 = vpop.eup %443  ;;  %v45_v20 = vpop.xlane.xlu1 %44 }
  0xa3   :  { %v40_v21 = vpop.xlane.xlu0 %39  ;;  %v119_v23 = vsel %vm98_vm0, %v774_v19, 0.0  ;;  %v446_v24 = vpop.eup %445  ;;  %v804_v46 = vsub.f32 %v671_v26, %v45_v20  ;;  %v811_v52 = vsub.f32 %v673_v27, %v45_v20 }
  0xa4   :  { %455 = vpow2.f32 %v328_v14  ;;  %120 = vadd.xlane.f32.xlu0 %v119_v23  ;;  %v129_v34 = vsel %vm98_vm0, %v446_v24, 0.0  ;;  %v815_v53 = vsub.f32 %v675_v28, %v40_v21  ;;  %v828_v63 = vsub.f32 %v677_v29, %v40_v21 }
  0xa5   :  { %457 = vpow2.f32 %v330_v15  ;;  %v57_v28 = vmul.f32 1.442695, %v811_v52 }
  0xa6   :  { %v779_v22 = vpop.eup %447  ;;  %v188_v18 = vpop.xlane.xlu1 %187  ;;  %v50_v5 = vmul.f32 1.442695, %v828_v63 }
  0xa7   :  { %v185_v25 = vpop.xlane.xlu0 %184  ;;  %v450_v30 = vpop.eup %449  ;;  %v782_v31 = vsub.f32 %v693_v36, %v188_v18  ;;  %v122_v33 = vsel %vm98_vm0, %v779_v22, 0.0 }
  0xa8   :  { %v785_v32 = vsub.f32 %v695_v37, %v185_v25  ;;  %123 = vadd.xlane.f32.xlu1 %v122_v33  ;;  %130 = vadd.xlane.f32.xlu0 %v129_v34  ;;  %v132_v36 = vsel %vm98_vm0, %v450_v30, 0.0 }
  0xa9   :  { %v201_v35 = vmul.f32 1.442695, %v782_v31 }
  0xaa   :  { %v199_v38 = vmul.f32 1.442695, %v785_v32  ;;  %v792_v39 = vpop.eup %451  ;;  %v196_v40 = vpop.xlane.xlu1 %195 }
  0xab   :  { %v193_v41 = vpop.xlane.xlu0 %192  ;;  %459 = vpow2.f32 %v201_v35  ;;  %v796_v37 = vsub.f32 %v707_v42, %v196_v40  ;;  %v316_v45 = vsel %vm275_vm1, %v792_v39, 0.0  ;;  %v806_v47 = vpop.eup %453 }
  0xac   :  { %v799_v44 = vsub.f32 %v709_v43, %v193_v41  ;;  %461 = vpow2.f32 %v199_v38  ;;  %133 = vadd.xlane.f32.xlu1 %v132_v36  ;;  %317 = vadd.xlane.f32.xlu0 %v316_v45  ;;  %v55_v43 = vmul.f32 1.442695, %v804_v46  ;;  %v319_v57 = vsel %vm275_vm1, %v806_v47, 0.0 }
  0xad   :  { %v211_v50 = vmul.f32 1.442695, %v796_v37  ;;  %v135_v45 = vsub.f32 %v744_v60, %v747_v61 }
  0xae   :  { %v209_v51 = vmul.f32 1.442695, %v799_v44  ;;  %v456_v42 = vpop.eup %455  ;;  %v300_v26 = vpop.xlane.xlu1 %299 }
  0xaf   :  { %v284_v56 = vpop.xlane.xlu0 %283  ;;  %463 = vpow2.f32 %v211_v50  ;;  %v820_v58 = vsub.f32 %v721_v48, %v300_v26  ;;  %v336_v27 = vsel %vm275_vm1, %v456_v42, 0.0  ;;  %v458_v62 = vpop.eup %457  ;;  %v48_v48 = vmul.f32 1.442695, %v815_v53 }
  0xb0   :  { %v823_v59 = vsub.f32 %v723_v49, %v284_v56  ;;  %465 = vpow2.f32 %v209_v51  ;;  %320 = vadd.xlane.f32.xlu1 %v319_v57  ;;  %337 = vadd.xlane.f32.xlu0 %v336_v27  ;;  %v339_v29 = vsel %vm275_vm1, %v458_v62, 0.0  ;;  %v136_v50 = vsub.f32 %v755_v6, %v752_v2 }
  0xb1   :  { %v332_v0 = vmul.f32 1.442695, %v820_v58  ;;  %467 = vpow2.f32 %v55_v43  ;;  %v137_v26 = vmul.f32 %v774_v19, %v135_v45  ;;  %v349_v56 = vsub.f32 %v760_v10, %v771_v17 }
  0xb2   :  { %v312_v1 = vmul.f32 1.442695, %v823_v59  ;;  %v303_v49 = vpop.xlane.xlu1 %302  ;;  %v138_v43 = vmul.f32 %v779_v22, %v136_v50  ;;  %v348_v57 = vsub.f32 %v763_v11, %v768_v16  ;;  %v220_v6 = vsub.f32 %v782_v31, %v796_v37 }
  0xb3   :  { %v287_v8 = vpop.xlane.xlu0 %286  ;;  %469 = vpow2.f32 %v332_v0  ;;  %v834_v4 = vsub.f32 %v735_v54, %v303_v49  ;;  %v139_v60 = vsel %vm98_vm0, %v137_v26, 0.0  ;;  %v353_v61 = vmul.f32 %v806_v47, %v349_v56 }
  0xb4   :  { %v837_v9 = vsub.f32 %v737_v55, %v287_v8  ;;  %471 = vpow2.f32 %v312_v1  ;;  %340 = vadd.xlane.f32.xlu1 %v339_v29  ;;  %v142_v27 = vsel %vm98_vm0, %v138_v43, 0.0  ;;  %v352_v2 = vmul.f32 %v792_v39, %v348_v57 }
  0xb5   :  { %v460_v3 = vpop.eup %459  ;;  %473 = vpow2.f32 %v57_v28  ;;  %v334_v7 = vmul.f32 1.442695, %v834_v4  ;;  %v219_v19 = vsub.f32 %v785_v32, %v799_v44  ;;  %v359_v10 = vsel %vm275_vm1, %v353_v61, 0.0 }
  0xb6   :  { %v314_v12 = vmul.f32 1.442695, %v837_v9  ;;  %v462_v13 = vpop.eup %461  ;;  %475 = vpow2.f32 %v48_v48  ;;  %v206_v54 = vsel %vm98_vm0, %v460_v3, 0.0  ;;  %v356_v11 = vsel %vm275_vm1, %v352_v2, 0.0 }
  0xb7   :  { %477 = vpow2.f32 %v334_v7  ;;  %v203_v55 = vsel %vm98_vm0, %v462_v13, 0.0  ;;  %v221_v16 = vmul.f32 %v462_v13, %v219_v19  ;;  %v222_v17 = vmul.f32 %v460_v3, %v220_v6 }
  0xb8   :  { %479 = vpow2.f32 %v314_v12  ;;  %207 = vadd.xlane.f32.xlu1 %v206_v54  ;;  %204 = vadd.xlane.f32.xlu0 %v203_v55  ;;  %v62_v22 = vsub.f32 %v815_v53, %v804_v46  ;;  %v63_v39 = vsub.f32 %v828_v63, %v811_v52  ;;  %v350_v31 = vsub.f32 %v823_v59, %v820_v58 }
  0xb9   :  { %v464_v14 = vpop.eup %463  ;;  %481 = vpow2.f32 %v50_v5  ;;  %v223_v32 = vsel %vm98_vm0, %v221_v16, 0.0  ;;  %v226_v44 = vsel %vm98_vm0, %v222_v17, 0.0  ;;  %v351_v46 = vsub.f32 %v837_v9, %v834_v4 }
  0xba   :  { %v466_v15 = vpop.eup %465  ;;  %v216_v20 = vsel %vm98_vm0, %v464_v14, 0.0 }
  0xbb   :  { %v213_v21 = vsel %vm98_vm0, %v466_v15, 0.0  ;;  %v468_v23 = vpop.eup %467 }
  0xbc   :  { %217 = vadd.xlane.f32.xlu1 %v216_v20  ;;  %214 = vadd.xlane.f32.xlu0 %v213_v21 }
  0xbd   :  { %v470_v24 = vpop.eup %469 }
  0xbe   :  { %v472_v18 = vpop.eup %471  ;;  %v342_v25 = vsel %vm275_vm1, %v470_v24, 0.0 }
  0xbf   :  { %v474_v30 = vpop.eup %473  ;;  %v322_v33 = vsel %vm275_vm1, %v472_v18, 0.0  ;;  %v354_v62 = vmul.f32 %v472_v18, %v350_v31 }
  0xc0   :  { %v476_v34 = vpop.eup %475  ;;  %343 = vadd.xlane.f32.xlu1 %v342_v25  ;;  %323 = vadd.xlane.f32.xlu0 %v322_v33  ;;  %v59_v51 = vadd.f32 %v474_v30, %v468_v23 }
  0xc1   :  { %v478_v35 = vpop.eup %477  ;;  %v64_v37 = vmul.f32 %v476_v34, %v62_v22  ;;  %v362_v52 = vsel %vm275_vm1, %v354_v62, 0.0 }
  0xc2   :  { %v480_v38 = vpop.eup %479  ;;  %v345_v40 = vsel %vm275_vm1, %v478_v35, 0.0 }
  0xc3   :  { %v482_v41 = vpop.eup %481  ;;  %v325_v36 = vsel %vm275_vm1, %v480_v38, 0.0  ;;  %v355_v28 = vmul.f32 %v480_v38, %v351_v46 }
  0xc4   :  { %346 = vadd.xlane.f32.xlu1 %v345_v40  ;;  %326 = vadd.xlane.f32.xlu0 %v325_v36  ;;  %v52_v42 = vadd.f32 %v482_v41, %v476_v34  ;;  %v65_v47 = vmul.f32 %v482_v41, %v63_v39 }
  0xc5   :  { %v365_v58 = vsel %vm275_vm1, %v355_v28, 0.0 }
  0xc6   :  { %v66_v53 = vadd.f32 %v65_v47, %v64_v37 }
  0xc8   :  { %60 = vadd.xlane.f32.xlu1 %v59_v51  ;;  %53 = vadd.xlane.f32.xlu0 %v52_v42 }
  0xcc   :  { %143 = vadd.xlane.f32.xlu1 %v142_v27  ;;  %140 = vadd.xlane.f32.xlu0 %v139_v60 }
  0xd0   :  { %360 = vadd.xlane.f32.xlu1 %v359_v10  ;;  %357 = vadd.xlane.f32.xlu0 %v356_v11 }
  0xd4   :  { %224 = vadd.xlane.f32.xlu1 %v223_v32  ;;  %227 = vadd.xlane.f32.xlu0 %v226_v44 }
  0xd8   :  { %363 = vadd.xlane.f32.xlu1 %v362_v52  ;;  %67 = vadd.xlane.f32.xlu0 %v66_v53 }
  0xdc   :  { %366 = vadd.xlane.f32.xlu0 %v365_v58 }
 0x131   :  { %v121_v59 = vpop.xlane.xlu0 %120 }
 0x132   :  { %483 = vrcp.f32 %v121_v59 }
 0x133   :  { %485 = vlog2.f32 %v121_v59 }
 0x135   :  { %v124_v63 = vpop.xlane.xlu1 %123  ;;  %v131_v0 = vpop.xlane.xlu0 %130 }
 0x136   :  { %487 = vrcp.f32 %v124_v63 }
 0x137   :  { %489 = vlog2.f32 %v124_v63 }
 0x138   :  { %491 = vlog2.f32 %v131_v0 }
 0x139   :  { %v134_v1 = vpop.xlane.xlu1 %133  ;;  %v318_v48 = vpop.xlane.xlu0 %317 }
 0x13a   :  { %493 = vlog2.f32 %v134_v1 }
 0x13b   :  { %495 = vrcp.f32 %v318_v48 }
 0x13c   :  { %497 = vlog2.f32 %v318_v48  ;;  %v484_v7 = vpop.eup %483 }
 0x13d   :  { %v321_v49 = vpop.xlane.xlu1 %320  ;;  %v338_v8 = vpop.xlane.xlu0 %337 }
 0x13e   :  { %499 = vrcp.f32 %v321_v49  ;;  %v486_v12 = vpop.eup %485 }
 0x13f   :  { %501 = vlog2.f32 %v321_v49  ;;  %v154_v45 = vmul.f32 0.6931472, %v486_v12 }
 0x140   :  { %503 = vlog2.f32 %v338_v8  ;;  %v488_v13 = vpop.eup %487 }
 0x141   :  { %v341_v29 = vpop.xlane.xlu1 %340  ;;  %v490_v14 = vpop.eup %489 }
 0x142   :  { %505 = vlog2.f32 %v341_v29  ;;  %v492_v15 = vpop.eup %491  ;;  %v156_v51 = vmul.f32 0.6931472, %v490_v14 }
 0x143   :  { %v150_v34 = vmul.f32 0.6931472, %v492_v15 }
 0x144   :  { %v494_v20 = vpop.eup %493 }
 0x145   :  { %v208_v4 = vpop.xlane.xlu1 %207  ;;  %v205_v9 = vpop.xlane.xlu0 %204  ;;  %v152_v41 = vmul.f32 0.6931472, %v494_v20  ;;  %v157_v26 = vsub.f32 %v150_v34, %v154_v45 }
 0x146   :  { %507 = vrcp.f32 %v208_v4  ;;  %v496_v21 = vpop.eup %495 }
 0x147   :  { %509 = vlog2.f32 %v208_v4  ;;  %v498_v18 = vpop.eup %497  ;;  %v158_v27 = vsub.f32 %v152_v41, %v156_v51 }
 0x148   :  { %511 = vrcp.f32 %v205_v9  ;;  %v500_v25 = vpop.eup %499  ;;  %v385_v37 = vmul.f32 0.6931472, %v498_v18 }
 0x149   :  { %v218_v3 = vpop.xlane.xlu1 %217  ;;  %v215_v5 = vpop.xlane.xlu0 %214  ;;  %513 = vlog2.f32 %v205_v9 }
 0x14a   :  { %515 = vlog2.f32 %v218_v3  ;;  %v502_v30 = vpop.eup %501 }
 0x14b   :  { %517 = vlog2.f32 %v215_v5  ;;  %v504_v33 = vpop.eup %503  ;;  %v387_v62 = vmul.f32 0.6931472, %v502_v30 }
 0x14c   :  { %v506_v40 = vpop.eup %505  ;;  %v377_v19 = vmul.f32 0.6931472, %v504_v33 }
 0x14d   :  { %v344_v54 = vpop.xlane.xlu1 %343  ;;  %v324_v55 = vpop.xlane.xlu0 %323  ;;  %v379_v17 = vmul.f32 0.6931472, %v506_v40 }
 0x14e   :  { %519 = vlog2.f32 %v344_v54  ;;  %v392_v59 = vsub.f32 %v377_v19, %v385_v37 }
 0x14f   :  { %521 = vlog2.f32 %v324_v55  ;;  %v393_v8 = vsub.f32 %v379_v17, %v387_v62 }
 0x150   :  { %v508_v36 = vpop.eup %507 }
 0x151   :  { %v347_v23 = vpop.xlane.xlu1 %346  ;;  %v327_v24 = vpop.xlane.xlu0 %326 }
 0x152   :  { %523 = vlog2.f32 %v347_v23  ;;  %v510_v50 = vpop.eup %509 }
 0x153   :  { %v512_v42 = vpop.eup %511  ;;  %v240_v3 = vmul.f32 0.6931472, %v510_v50 }
 0x154   :  { %v514_v57 = vpop.eup %513 }
 0x155   :  { %v61_v35 = vpop.xlane.xlu1 %60  ;;  %v54_v38 = vpop.xlane.xlu0 %53  ;;  %v238_v1 = vmul.f32 0.6931472, %v514_v57 }
 0x156   :  { %525 = vlog2.f32 %v61_v35  ;;  %v516_v2 = vpop.eup %515 }
 0x157   :  { %527 = vlog2.f32 %v327_v24  ;;  %v518_v6 = vpop.eup %517  ;;  %v236_v28 = vmul.f32 0.6931472, %v516_v2 }
 0x158   :  { %529 = vlog2.f32 %v54_v38  ;;  %v520_v16 = vpop.eup %519  ;;  %v234_v46 = vmul.f32 0.6931472, %v518_v6 }
 0x159   :  { %v144_v43 = vpop.xlane.xlu1 %143  ;;  %v141_v56 = vpop.xlane.xlu0 %140  ;;  %531 = vrcp.f32 %v324_v55  ;;  %v381_v48 = vmul.f32 0.6931472, %v520_v16  ;;  %v242_v20 = vsub.f32 %v236_v28, %v240_v3 }
 0x15a   :  { %v148_v60 = vmul.f32 %v488_v13, %v144_v43  ;;  %v147_v61 = vmul.f32 %v484_v7, %v141_v56  ;;  %533 = vrcp.f32 %v54_v38  ;;  %v522_v31 = vpop.eup %521  ;;  %v241_v54 = vsub.f32 %v234_v46, %v238_v1 }
 0x15b   :  { %535 = vrcp.f32 %v327_v24  ;;  %v389_v49 = vmul.f32 0.6931472, %v522_v31 }
 0x15c   :  { %v160_v10 = vadd.f32 %v158_v27, %v148_v60  ;;  %v159_v11 = vadd.f32 %v157_v26, %v147_v61  ;;  %v524_v44 = vpop.eup %523 }
 0x15d   :  { %v361_v22 = vpop.xlane.xlu1 %360  ;;  %v358_v39 = vpop.xlane.xlu0 %357  ;;  %v383_v23 = vmul.f32 0.6931472, %v524_v44  ;;  %v394_v30 = vsub.f32 %v381_v48, %v389_v49 }
 0x15e   :  { %v161_v47 = vsel %vm77_vm2, %v159_v11, 0.0  ;;  %v162_v32 = vsel %vm77_vm2, %v160_v10, 0.0  ;;  %v373_v58 = vmul.f32 %v500_v25, %v361_v22  ;;  %v372_v63 = vmul.f32 %v496_v21, %v358_v39 }
 0x15f   :  { %v163_v53 = vadd.f32 %v162_v32, %v161_v47 }
 0x160   :  { %v526_v52 = vpop.eup %525  ;;  %v397_v14 = vadd.f32 %v393_v8, %v373_v58  ;;  %v396_v15 = vadd.f32 %v392_v59, %v372_v63 }
 0x161   :  { %v528_v0 = vpop.eup %527  ;;  %v225_v29 = vpop.xlane.xlu1 %224  ;;  %164 = vadd.xlane.f32.xlu0 %v163_v53  ;;  %v72_v5 = vmul.f32 0.6931472, %v526_v52 }
 0x162   :  { %v228_v4 = vpop.xlane.xlu0 %227  ;;  %v530_v9 = vpop.eup %529  ;;  %v231_v7 = vmul.f32 %v512_v42, %v225_v29  ;;  %v391_v24 = vmul.f32 0.6931472, %v528_v0  ;;  %v401_v41 = vsel %vm77_vm2, %v397_v14, 0.0 }
 0x163   :  { %v232_v12 = vmul.f32 %v508_v36, %v228_v4  ;;  %v74_v13 = vmul.f32 0.6931472, %v530_v9  ;;  %v532_v55 = vpop.eup %531  ;;  %v400_v36 = vsel %vm77_vm2, %v396_v15, 0.0 }
 0x164   :  { %v534_v21 = vpop.eup %533  ;;  %v243_v18 = vadd.f32 %v241_v54, %v231_v7  ;;  %v395_v42 = vsub.f32 %v383_v23, %v391_v24  ;;  %v402_v61 = vadd.f32 %v401_v41, %v400_v36 }
 0x165   :  { %v364_v25 = vpop.xlane.xlu1 %363  ;;  %v244_v34 = vadd.f32 %v242_v20, %v232_v12  ;;  %v75_v40 = vsub.f32 %v72_v5, %v74_v13  ;;  %v536_v51 = vpop.eup %535 }
 0x166   :  { %v68_v33 = vpop.xlane.xlu0 %67  ;;  %v374_v35 = vmul.f32 %v532_v55, %v364_v25  ;;  %v245_v26 = vsel %vm77_vm2, %v243_v18, 0.0 }
 0x167   :  { %v70_v38 = vmul.f32 %v534_v21, %v68_v33  ;;  %v246_v27 = vsel %vm77_vm2, %v244_v34, 0.0 }
 0x168   :  { %v398_v45 = vadd.f32 %v394_v30, %v374_v35  ;;  %v247_v6 = vadd.f32 %v246_v27, %v245_v26 }
 0x169   :  { %v76_v50 = vadd.f32 %v75_v40, %v70_v38 }
 0x16a   :  { %v367_v43 = vpop.xlane.xlu0 %366  ;;  %v403_v60 = vsel %vm77_vm2, %v398_v45, 0.0 }
 0x16b   :  { %v375_v56 = vmul.f32 %v536_v51, %v367_v43  ;;  %v78_v57 = vsel %vm77_vm2, %v76_v50, 0.0  ;;  %v404_v19 = vadd.f32 %v403_v60, %v402_v61 }
 0x16c   :  { %79 = vadd.xlane.f32.xlu1 %v78_v57 }
 0x16d   :  { %v399_v2 = vadd.f32 %v395_v42, %v375_v56 }
 0x16f   :  { %v405_v10 = vsel %vm77_vm2, %v399_v2, 0.0 }
 0x170   :  { %248 = vadd.xlane.f32.xlu1 %v247_v6  ;;  %v406_v11 = vadd.f32 %v405_v10, %v404_v19 }
 0x172   :  { %407 = vadd.xlane.f32.xlu0 %v406_v11 }
 0x1ee   :  { %v165_v16 = vpop.xlane.xlu0 %164 }
 0x1ef   :  { %v166_v17 = vrot.slane %v165_v16, 4 }
 0x1f1   :  { %v167_v22 = vadd.f32 %v166_v17, %v165_v16 }
 0x1f3   :  { %v168_v39 = vrot.slane %v167_v22, 2 }
 0x1f5   :  { %v169_v44 = vadd.f32 %v168_v39, %v167_v22 }
 0x1f7   :  { %v170_v59 = vrot.slane %v169_v44, 1 }
 0x1f9   :  { %v80_v31 = vpop.xlane.xlu1 %79  ;;  %v171_v29 = vadd.f32 %v170_v59, %v169_v44 }
 0x1fa   :  { %v81_v37 = vrot.slane %v80_v31, 4 }
 0x1fc   :  { %v82_v47 = vadd.f32 %v81_v37, %v80_v31 }
 0x1fd   :  { %v249_v32 = vpop.xlane.xlu1 %248 }
 0x1fe   :  { %v83_v62 = vrot.slane %v82_v47, 2  ;;  %v250_v46 = vrot.slane %v249_v32, 4 }
 0x1ff   :  { %v408_v53 = vpop.xlane.xlu0 %407 }
 0x200   :  { %v251_v52 = vadd.f32 %v250_v46, %v249_v32  ;;  %v409_v28 = vrot.slane %v408_v53, 4  ;;  %v84_v58 = vadd.f32 %v83_v62, %v82_v47 }
 0x202   :  { %v252_v63 = vrot.slane %v251_v52, 2  ;;  %v410_v0 = vadd.f32 %v409_v28, %v408_v53  ;;  %v85_v1 = vrot.slane %v84_v58, 1 }
 0x204   :  { %v253_v48 = vadd.f32 %v252_v63, %v251_v52  ;;  %v411_v49 = vrot.slane %v410_v0, 2  ;;  %v86_v8 = vadd.f32 %v85_v1, %v84_v58 }
 0x206   :  { %v412_v4 = vadd.f32 %v411_v49, %v410_v0  ;;  %434 = vpush %v86_v8  ;;  %v254_v9 = vrot.slane %v253_v48, 1 }
 0x207   :  { %436 = vpush %v171_v29 }
 0x208   :  { %v255_v3 = vadd.f32 %v254_v9, %v253_v48  ;;  %v413_v5 = vrot.slane %v412_v4, 1 }
 0x20a   :  { %438 = vpush %v255_v3  ;;  %v414_v7 = vadd.f32 %v413_v5, %v412_v4 }
 0x20c   :  { %440 = vpush %v414_v7 }
 0x237   :  { %s435_s3 = spop %434 }
 0x238   :  { %s88_s7 = smul.f32 2.0, %s435_s3  ;;  %s437_s1 = spop %436 }
 0x239   :  { %s173_s5 = smul.f32 0.7, %s437_s1 }
 0x23b   :  { %s439_s17 = spop %438  ;;  %s174_s18 = sadd.f32 %s173_s5, %s88_s7 }
 0x23c   :  { %s257_s19 = smul.f32 0.5, %s439_s17 }
 0x23d   :  { %s441_s20 = spop %440 }
 0x23e   :  { %s258_s23 = sadd.f32 %s257_s19, %s174_s18  ;;  %s416_s24 = smul.f32 0.15, %s441_s20 }
 0x240   :  { %s417_s25 = sadd.f32 %s416_s24, %s258_s23 }
 0x242   :  { %v418_v12 = vstv %s417_s25 }
 0x243   :  { %419 = vst [vmem:[#allocation2] sm:$0xff] %v418_v12 }
 0x244   :  { %548 = shalt.err (!%p545_p4)
}
 0x245   :  { %s549_s0 = scalar_lea.hbm %s912_s8, 128 }
 0x246   :  { %p550_p5 = scmp.ne.s32.totalorder %s912_s8, %s549_s0  ;;  %p553_p6 = scmp.lt.u32.totalorder %s549_s0, %s912_s8 }
 0x248   :  { %p555_p7 = pnand %p553_p6, %p550_p5 }
 0x24a   :  { %558 = shalt.err (!%p555_p7)
}
 0x24b   :  { %429 = dma.vmem_to_hbm [thread:$0]  %s427_s22, 128, %s912_s8, [#allocation3]  }
 0x24c   :  { %559 = dma.done.wait [#allocation3], 128  }
 0x24d   :  { %560 = vsyncadd [#allocation3], 4294967168 }
 0x24e   :  { %433 = vsyncpa [#allocation3], 1 }

</bundles_post_ra>
